<compile_context>
chip_gen: v7x
topology: tpu7x:2x2x1
jax: 0.10.0
libtpu: 0.0.40
codegen_flags: <defaults>
</compile_context>

<pallas_src>
import functools

import jax
import jax.numpy as jnp
from jax.experimental import pallas as pl
from jax.experimental.pallas import tpu as pltpu

_BN_EPS = 1e-5
_LANE = 128


def _ceil_to(n, m):
    return ((n + m - 1) // m) * m


def _pad2(a, rows, cols, dtype):
    out = jnp.zeros((rows, cols), dtype)
    return out.at[: a.shape[0], : a.shape[1]].set(a.astype(dtype))


def _pad_row(v, cols, dtype):
    out = jnp.zeros((1, cols), dtype)
    return out.at[0, : v.shape[0]].set(v.astype(dtype))


# ---------------------------------------------------------------------------
# The single fused kernel
# ---------------------------------------------------------------------------
def _dcvae_fused_kernel(*refs, n_enc_hidden, n_dec_hidden, lat_pad):
    it = iter(refs)
    x_ref, c_ref, eps_ref = next(it), next(it), next(it)

    def mm(a_f32, w_ref):
        # bf16 MXU matmul with f32 accumulation (weights are pre-cast to bf16).
        return jnp.dot(a_f32.astype(jnp.bfloat16), w_ref[...],
                       preferred_element_type=jnp.float32)

    def bn_relu(y, g_ref, beta_ref):
        # Training-mode BatchNorm1d (biased variance), one-pass stats, f32.
        inv_b = 1.0 / y.shape[0]
        mean = jnp.sum(y, axis=0, keepdims=True) * inv_b
        mean_sq = jnp.sum(y * y, axis=0, keepdims=True) * inv_b
        var = mean_sq - mean * mean
        y = (y - mean) * jax.lax.rsqrt(var + _BN_EPS)
        return jnp.maximum(y * g_ref[...] + beta_ref[...], 0.0)

    # ---- encoder hidden layer 0: split matmul over (rna | coord) ----
    # (hidden-layer bias is dropped: cancelled exactly by BN mean subtraction)
    wx, wc, g, be = next(it), next(it), next(it), next(it)
    h = mm(x_ref[...], wx) + mm(c_ref[...], wc)
    h = bn_relu(h, g, be)
    for _ in range(n_enc_hidden - 1):
        w, g, be = next(it), next(it), next(it)
        h = bn_relu(mm(h, w), g, be)

    # ---- fused mu|logvar head + reparametrization ----
    w_head, b_head = next(it), next(it)
    head = mm(h, w_head) + b_head[...]
    mu = head[:, :lat_pad]
    logvar = head[:, lat_pad:]
    z = eps_ref[...] * jnp.exp(0.5 * logvar) + mu

    # ---- decoder ----
    h = z
    for _ in range(n_dec_hidden):
        w, g, be = next(it), next(it), next(it)
        h = bn_relu(mm(h, w), g, be)
    w_out, b_out = next(it), next(it)
    recon = mm(h, w_out) + b_out[...]

    # ---- outputs (all padded to 128 lanes -> unmasked vst) ----
    recon_ref, z_ref, mu_ref, lv_ref = next(it), next(it), next(it), next(it)
    recon_ref[...] = recon
    z_ref[...] = z
    mu_ref[...] = mu
    lv_ref[...] = logvar


# ---------------------------------------------------------------------------
# Deterministic parameter construction (mirrors nn.Linear / nn.BatchNorm1d init)
# ---------------------------------------------------------------------------
def _init_layer(key, fan_in, fan_out):
    k1, k2 = jax.random.split(key)
    limit = 1.0 / jnp.sqrt(jnp.float32(fan_in))
    w = jax.random.uniform(k1, (fan_in, fan_out), jnp.float32, -limit, limit)
    b = jax.random.uniform(k2, (fan_out,), jnp.float32, -limit, limit)
    gamma = jnp.ones((fan_out,), jnp.float32)
    beta = jnp.zeros((fan_out,), jnp.float32)
    return (w, b, gamma, beta)


def init_dcvae_params(key, *, input_size, rna_layers, latent_dim, h_dim,
                      num_conditions):
    enc_dims = [input_size] + list(rna_layers)
    dec_dims = ([input_size] + list(rna_layers))[::-1]

    keys = iter(jax.random.split(key, 16))
    params = {"enc_hidden": [], "dec_hidden": []}

    in_dim = enc_dims[0] + num_conditions            # condition concat at layer 0
    for out_dim in enc_dims[1:]:
        params["enc_hidden"].append(_init_layer(next(keys), in_dim, out_dim))
        in_dim = out_dim
    params["enc_mu"] = _init_layer(next(keys), in_dim, latent_dim)
    params["enc_logvar"] = _init_layer(next(keys), in_dim, latent_dim)

    in_dim = h_dim                                    # decoder is unconditional
    for out_dim in dec_dims[:-1]:
        params["dec_hidden"].append(_init_layer(next(keys), in_dim, out_dim))
        in_dim = out_dim
    params["dec_out"] = _init_layer(next(keys), in_dim, dec_dims[-1])
    return params


# ---------------------------------------------------------------------------
# Build the fused forward: pad + pack params once, return a jitted callable
# ---------------------------------------------------------------------------
def make_dcvae_forward(params, *, input_size, rna_layers, latent_dim, h_dim,
                       num_conditions):
    assert h_dim == latent_dim, "decoder consumes z directly (h_dim == latent_dim)"
    enc_dims = [input_size] + list(rna_layers)
    dec_dims = ([input_size] + list(rna_layers))[::-1]
    n_enc_hidden = len(enc_dims) - 1
    n_dec_hidden = len(dec_dims) - 1

    p_in = _ceil_to(input_size, _LANE)
    p_c = _ceil_to(num_conditions, _LANE)
    p_lat = _ceil_to(latent_dim, _LANE)
    p_enc = [_ceil_to(d, _LANE) for d in enc_dims[1:]]

    ops = []

    # encoder hidden layer 0: split the concat weight into rna / coord blocks
    (w0, _b0, g0, be0) = params["enc_hidden"][0]
    ops += [
        _pad2(w0[:input_size], p_in, p_enc[0], jnp.bfloat16),
        _pad2(w0[input_size:], p_c, p_enc[0], jnp.bfloat16),
        _pad_row(g0, p_enc[0], jnp.float32),
        _pad_row(be0, p_enc[0], jnp.float32),
    ]
    in_p = p_enc[0]
    for li in range(1, n_enc_hidden):
        (w, _b, g, be) = params["enc_hidden"][li]
        ops += [_pad2(w, in_p, p_enc[li], jnp.bfloat16),
                _pad_row(g, p_enc[li], jnp.float32),
                _pad_row(be, p_enc[li], jnp.float32)]
        in_p = p_enc[li]

    # fused mu|logvar head: W:[hid, 2*p_lat], b:[1, 2*p_lat]
    (wmu, bmu, _, _) = params["enc_mu"]
    (wlv, blv, _, _) = params["enc_logvar"]
    w_head = jnp.zeros((in_p, 2 * p_lat), jnp.bfloat16)
    w_head = w_head.at[: wmu.shape[0], : wmu.shape[1]].set(wmu.astype(jnp.bfloat16))
    w_head = w_head.at[: wlv.shape[0], p_lat: p_lat + wlv.shape[1]].set(
        wlv.astype(jnp.bfloat16))
    b_head = jnp.zeros((1, 2 * p_lat), jnp.float32)
    b_head = b_head.at[0, : bmu.shape[0]].set(bmu)
    b_head = b_head.at[0, p_lat: p_lat + blv.shape[0]].set(blv)
    ops += [w_head, b_head]

    # decoder
    in_p = p_lat
    for li in range(n_dec_hidden):
        (w, _b, g, be) = params["dec_hidden"][li]
        out_p = _ceil_to(dec_dims[li], _LANE)
        ops += [_pad2(w, in_p, out_p, jnp.bfloat16),
                _pad_row(g, out_p, jnp.float32),
                _pad_row(be, out_p, jnp.float32)]
        in_p = out_p
    (w, b, _, _) = params["dec_out"]
    ops += [_pad2(w, in_p, p_in, jnp.bfloat16), _pad_row(b, p_in, jnp.float32)]

    kern = functools.partial(_dcvae_fused_kernel,
                             n_enc_hidden=n_enc_hidden,
                             n_dec_hidden=n_dec_hidden,
                             lat_pad=p_lat)
    vmem = pl.BlockSpec(memory_space=pltpu.MemorySpace.VMEM)

    @jax.jit
    def forward(rna, coord, eps):
        batch = rna.shape[0]
        x_p = jnp.zeros((batch, p_in), jnp.float32).at[:, :input_size].set(rna)
        c_p = jnp.zeros((batch, p_c), jnp.float32).at[:, :num_conditions].set(coord)
        e_p = jnp.zeros((batch, p_lat), jnp.float32).at[:, :latent_dim].set(eps)

        recon_p, z_p, mu_p, lv_p = pl.pallas_call(
            kern,
            out_shape=(
                jax.ShapeDtypeStruct((batch, p_in), jnp.float32),
                jax.ShapeDtypeStruct((batch, p_lat), jnp.float32),
                jax.ShapeDtypeStruct((batch, p_lat), jnp.float32),
                jax.ShapeDtypeStruct((batch, p_lat), jnp.float32),
            ),
            in_specs=[vmem] * (3 + len(ops)),
            out_specs=(vmem, vmem, vmem, vmem),
        )(x_p, c_p, e_p, *ops)

        return {
            "recon_rna": recon_p[:, :input_size],
            "z_rna": z_p[:, :latent_dim],
            "z_mean": mu_p[:, :latent_dim],
            "z_log_var": lv_p[:, :latent_dim],
        }

    return forward


# ---------------------------------------------------------------------------
# Pure-JAX f32 reference (original, un-restructured semantics) for validation
# ---------------------------------------------------------------------------
def dcvae_reference(params, rna, coord, eps):
    def bn(y, g, be):
        mean = jnp.mean(y, axis=0, keepdims=True)
        var = jnp.mean(jnp.square(y - mean), axis=0, keepdims=True)
        return (y - mean) * jax.lax.rsqrt(var + _BN_EPS) * g + be

    h = jnp.concatenate([rna, coord], axis=1)
    for (w, b, g, be) in params["enc_hidden"]:
        h = jnp.maximum(bn(h @ w + b, g, be), 0.0)
    mu = h @ params["enc_mu"][0] + params["enc_mu"][1]
    logvar = h @ params["enc_logvar"][0] + params["enc_logvar"][1]
    z = eps * jnp.exp(0.5 * logvar) + mu
    h = z
    for (w, b, g, be) in params["dec_hidden"]:
        h = jnp.maximum(bn(h @ w + b, g, be), 0.0)
    recon = h @ params["dec_out"][0] + params["dec_out"][1]
    return {"recon_rna": recon, "z_rna": z, "z_mean": mu, "z_log_var": logvar}


# ---------------------------------------------------------------------------
if __name__ == "__main__":
    B = 8
    input_size = 64
    rna_layers = [32, 16]
    latent_dim = 8
    h_dim = latent_dim          # decoder consumes z directly
    num_conditions = 4          # spatial coordinates -> conditional encoder

    key = jax.random.PRNGKey(0)
    kp, kx, kc, ke = jax.random.split(key, 4)

    params = init_dcvae_params(
        kp, input_size=input_size, rna_layers=rna_layers,
        latent_dim=latent_dim, h_dim=h_dim, num_conditions=num_conditions)

    rna = jax.random.normal(kx, (B, input_size), jnp.float32)
    coord = jax.random.normal(kc, (B, num_conditions), jnp.float32)
    eps = jax.random.normal(ke, (B, latent_dim), jnp.float32)   # randn_like(std)

    forward = make_dcvae_forward(
        params, input_size=input_size, rna_layers=rna_layers,
        latent_dim=latent_dim, h_dim=h_dim, num_conditions=num_conditions)

    outputs = forward(rna, coord, eps)
    jax.block_until_ready(outputs)

    assert outputs["recon_rna"].shape == (B, input_size)
    assert outputs["z_rna"].shape == (B, latent_dim)
    assert outputs["z_mean"].shape == (B, latent_dim)
    assert outputs["z_log_var"].shape == (B, latent_dim)

    # Loose numerical check vs. f32 reference (kernel matmuls run on the bf16 MXU path).
    ref = dcvae_reference(params, rna, coord, eps)
    for name in ("recon_rna", "z_rna", "z_mean", "z_log_var"):
        assert jnp.allclose(outputs[name], ref[name], atol=0.15, rtol=0.15), name

    print("KERNEL_OK")
</pallas_src>

<mosaic_0001>
module attributes {stable_mosaic.version = 11 : i64} {
  func.func @_dcvae_fused_kernel(%arg0: memref<8x128xf32, #tpu.memory_space<vmem>>, %arg1: memref<8x128xf32, #tpu.memory_space<vmem>>, %arg2: memref<8x128xf32, #tpu.memory_space<vmem>>, %arg3: memref<128x128xbf16, #tpu.memory_space<vmem>>, %arg4: memref<128x128xbf16, #tpu.memory_space<vmem>>, %arg5: memref<1x128xf32, #tpu.memory_space<vmem>>, %arg6: memref<1x128xf32, #tpu.memory_space<vmem>>, %arg7: memref<128x128xbf16, #tpu.memory_space<vmem>>, %arg8: memref<1x128xf32, #tpu.memory_space<vmem>>, %arg9: memref<1x128xf32, #tpu.memory_space<vmem>>, %arg10: memref<128x256xbf16, #tpu.memory_space<vmem>>, %arg11: memref<1x256xf32, #tpu.memory_space<vmem>>, %arg12: memref<128x128xbf16, #tpu.memory_space<vmem>>, %arg13: memref<1x128xf32, #tpu.memory_space<vmem>>, %arg14: memref<1x128xf32, #tpu.memory_space<vmem>>, %arg15: memref<128x128xbf16, #tpu.memory_space<vmem>>, %arg16: memref<1x128xf32, #tpu.memory_space<vmem>>, %arg17: memref<1x128xf32, #tpu.memory_space<vmem>>, %arg18: memref<128x128xbf16, #tpu.memory_space<vmem>>, %arg19: memref<1x128xf32, #tpu.memory_space<vmem>>, %arg20: memref<8x128xf32, #tpu.memory_space<vmem>>, %arg21: memref<8x128xf32, #tpu.memory_space<vmem>>, %arg22: memref<8x128xf32, #tpu.memory_space<vmem>>, %arg23: memref<8x128xf32, #tpu.memory_space<vmem>>) attributes {dimension_semantics = [], scalar_prefetch = 0 : i64, scratch_operands = 0 : i64, tpu.core_type = #tpu.core_type<tc>} {
    %c0 = arith.constant 0 : index
    %c0_0 = arith.constant 0 : index
    %0 = vector.load %arg0[%c0, %c0_0] : memref<8x128xf32, #tpu.memory_space<vmem>>, vector<8x128xf32>
    %1 = arith.truncf %0 : vector<8x128xf32> to vector<8x128xbf16>
    %c0_1 = arith.constant 0 : index
    %c0_2 = arith.constant 0 : index
    %2 = vector.load %arg3[%c0_1, %c0_2] : memref<128x128xbf16, #tpu.memory_space<vmem>>, vector<128x128xbf16>
    %cst = arith.constant dense<0.000000e+00> : vector<8x128xf32>
    %3 = tpu.matmul %1, %2, %cst {dimension_numbers = #tpu.dot_dimension_numbers<[1], [0], [0], [1], [0, 0, 1, 1], [], []>} : vector<8x128xbf16>, vector<128x128xbf16>, vector<8x128xf32> -> vector<8x128xf32>
    %c0_3 = arith.constant 0 : index
    %c0_4 = arith.constant 0 : index
    %4 = vector.load %arg1[%c0_3, %c0_4] : memref<8x128xf32, #tpu.memory_space<vmem>>, vector<8x128xf32>
    %5 = arith.truncf %4 : vector<8x128xf32> to vector<8x128xbf16>
    %c0_5 = arith.constant 0 : index
    %c0_6 = arith.constant 0 : index
    %6 = vector.load %arg4[%c0_5, %c0_6] : memref<128x128xbf16, #tpu.memory_space<vmem>>, vector<128x128xbf16>
    %cst_7 = arith.constant dense<0.000000e+00> : vector<8x128xf32>
    %7 = tpu.matmul %5, %6, %cst_7 {dimension_numbers = #tpu.dot_dimension_numbers<[1], [0], [0], [1], [0, 0, 1, 1], [], []>} : vector<8x128xbf16>, vector<128x128xbf16>, vector<8x128xf32> -> vector<8x128xf32>
    %8 = arith.addf %3, %7 : vector<8x128xf32>
    %cst_8 = arith.constant dense<0.000000e+00> : vector<128xf32>
    %9 = vector.multi_reduction <add>, %8, %cst_8 [0] : vector<8x128xf32> to vector<128xf32>
    %10 = vector.shape_cast %9 : vector<128xf32> to vector<1x128xf32>
    %cst_9 = arith.constant 1.250000e-01 : f32
    %11 = vector.broadcast %cst_9 : f32 to vector<1x128xf32>
    %12 = arith.mulf %10, %11 : vector<1x128xf32>
    %13 = arith.mulf %8, %8 : vector<8x128xf32>
    %cst_10 = arith.constant dense<0.000000e+00> : vector<128xf32>
    %14 = vector.multi_reduction <add>, %13, %cst_10 [0] : vector<8x128xf32> to vector<128xf32>
    %15 = vector.shape_cast %14 : vector<128xf32> to vector<1x128xf32>
    %cst_11 = arith.constant 1.250000e-01 : f32
    %16 = vector.broadcast %cst_11 : f32 to vector<1x128xf32>
    %17 = arith.mulf %15, %16 : vector<1x128xf32>
    %18 = arith.mulf %12, %12 : vector<1x128xf32>
    %19 = arith.subf %17, %18 : vector<1x128xf32>
    %20 = vector.broadcast %12 : vector<1x128xf32> to vector<8x128xf32>
    %21 = arith.subf %8, %20 : vector<8x128xf32>
    %cst_12 = arith.constant 9.99999974E-6 : f32
    %22 = vector.broadcast %cst_12 : f32 to vector<1x128xf32>
    %23 = arith.addf %19, %22 : vector<1x128xf32>
    %24 = math.rsqrt %23 : vector<1x128xf32>
    %25 = vector.broadcast %24 : vector<1x128xf32> to vector<8x128xf32>
    %26 = arith.mulf %21, %25 : vector<8x128xf32>
    %c0_13 = arith.constant 0 : index
    %c0_14 = arith.constant 0 : index
    %27 = vector.load %arg5[%c0_13, %c0_14] : memref<1x128xf32, #tpu.memory_space<vmem>>, vector<1x128xf32>
    %28 = vector.broadcast %27 : vector<1x128xf32> to vector<8x128xf32>
    %29 = arith.mulf %26, %28 : vector<8x128xf32>
    %c0_15 = arith.constant 0 : index
    %c0_16 = arith.constant 0 : index
    %30 = vector.load %arg6[%c0_15, %c0_16] : memref<1x128xf32, #tpu.memory_space<vmem>>, vector<1x128xf32>
    %31 = vector.broadcast %30 : vector<1x128xf32> to vector<8x128xf32>
    %32 = arith.addf %29, %31 : vector<8x128xf32>
    %cst_17 = arith.constant 0.000000e+00 : f32
    %33 = vector.broadcast %cst_17 : f32 to vector<8x128xf32>
    %34 = arith.maximumf %32, %33 : vector<8x128xf32>
    %35 = arith.truncf %34 : vector<8x128xf32> to vector<8x128xbf16>
    %c0_18 = arith.constant 0 : index
    %c0_19 = arith.constant 0 : index
    %36 = vector.load %arg7[%c0_18, %c0_19] : memref<128x128xbf16, #tpu.memory_space<vmem>>, vector<128x128xbf16>
    %cst_20 = arith.constant dense<0.000000e+00> : vector<8x128xf32>
    %37 = tpu.matmul %35, %36, %cst_20 {dimension_numbers = #tpu.dot_dimension_numbers<[1], [0], [0], [1], [0, 0, 1, 1], [], []>} : vector<8x128xbf16>, vector<128x128xbf16>, vector<8x128xf32> -> vector<8x128xf32>
    %cst_21 = arith.constant dense<0.000000e+00> : vector<128xf32>
    %38 = vector.multi_reduction <add>, %37, %cst_21 [0] : vector<8x128xf32> to vector<128xf32>
    %39 = vector.shape_cast %38 : vector<128xf32> to vector<1x128xf32>
    %cst_22 = arith.constant 1.250000e-01 : f32
    %40 = vector.broadcast %cst_22 : f32 to vector<1x128xf32>
    %41 = arith.mulf %39, %40 : vector<1x128xf32>
    %42 = arith.mulf %37, %37 : vector<8x128xf32>
    %cst_23 = arith.constant dense<0.000000e+00> : vector<128xf32>
    %43 = vector.multi_reduction <add>, %42, %cst_23 [0] : vector<8x128xf32> to vector<128xf32>
    %44 = vector.shape_cast %43 : vector<128xf32> to vector<1x128xf32>
    %cst_24 = arith.constant 1.250000e-01 : f32
    %45 = vector.broadcast %cst_24 : f32 to vector<1x128xf32>
    %46 = arith.mulf %44, %45 : vector<1x128xf32>
    %47 = arith.mulf %41, %41 : vector<1x128xf32>
    %48 = arith.subf %46, %47 : vector<1x128xf32>
    %49 = vector.broadcast %41 : vector<1x128xf32> to vector<8x128xf32>
    %50 = arith.subf %37, %49 : vector<8x128xf32>
    %cst_25 = arith.constant 9.99999974E-6 : f32
    %51 = vector.broadcast %cst_25 : f32 to vector<1x128xf32>
    %52 = arith.addf %48, %51 : vector<1x128xf32>
    %53 = math.rsqrt %52 : vector<1x128xf32>
    %54 = vector.broadcast %53 : vector<1x128xf32> to vector<8x128xf32>
    %55 = arith.mulf %50, %54 : vector<8x128xf32>
    %c0_26 = arith.constant 0 : index
    %c0_27 = arith.constant 0 : index
    %56 = vector.load %arg8[%c0_26, %c0_27] : memref<1x128xf32, #tpu.memory_space<vmem>>, vector<1x128xf32>
    %57 = vector.broadcast %56 : vector<1x128xf32> to vector<8x128xf32>
    %58 = arith.mulf %55, %57 : vector<8x128xf32>
    %c0_28 = arith.constant 0 : index
    %c0_29 = arith.constant 0 : index
    %59 = vector.load %arg9[%c0_28, %c0_29] : memref<1x128xf32, #tpu.memory_space<vmem>>, vector<1x128xf32>
    %60 = vector.broadcast %59 : vector<1x128xf32> to vector<8x128xf32>
    %61 = arith.addf %58, %60 : vector<8x128xf32>
    %cst_30 = arith.constant 0.000000e+00 : f32
    %62 = vector.broadcast %cst_30 : f32 to vector<8x128xf32>
    %63 = arith.maximumf %61, %62 : vector<8x128xf32>
    %64 = arith.truncf %63 : vector<8x128xf32> to vector<8x128xbf16>
    %c0_31 = arith.constant 0 : index
    %c0_32 = arith.constant 0 : index
    %65 = vector.load %arg10[%c0_31, %c0_32] : memref<128x256xbf16, #tpu.memory_space<vmem>>, vector<128x256xbf16>
    %cst_33 = arith.constant dense<0.000000e+00> : vector<8x256xf32>
    %66 = tpu.matmul %64, %65, %cst_33 {dimension_numbers = #tpu.dot_dimension_numbers<[1], [0], [0], [1], [0, 0, 1, 1], [], []>} : vector<8x128xbf16>, vector<128x256xbf16>, vector<8x256xf32> -> vector<8x256xf32>
    %c0_34 = arith.constant 0 : index
    %c0_35 = arith.constant 0 : index
    %67 = vector.load %arg11[%c0_34, %c0_35] : memref<1x256xf32, #tpu.memory_space<vmem>>, vector<1x256xf32>
    %68 = vector.broadcast %67 : vector<1x256xf32> to vector<8x256xf32>
    %69 = arith.addf %66, %68 : vector<8x256xf32>
    %70 = vector.extract_strided_slice %69 {offsets = [0, 0], sizes = [8, 128], strides = [1, 1]} : vector<8x256xf32> to vector<8x128xf32>
    %71 = vector.extract_strided_slice %69 {offsets = [0, 128], sizes = [8, 128], strides = [1, 1]} : vector<8x256xf32> to vector<8x128xf32>
    %c0_36 = arith.constant 0 : index
    %c0_37 = arith.constant 0 : index
    %72 = vector.load %arg2[%c0_36, %c0_37] : memref<8x128xf32, #tpu.memory_space<vmem>>, vector<8x128xf32>
    %cst_38 = arith.constant 5.000000e-01 : f32
    %73 = vector.broadcast %cst_38 : f32 to vector<8x128xf32>
    %74 = arith.mulf %73, %71 : vector<8x128xf32>
    %75 = math.exp %74 : vector<8x128xf32>
    %76 = arith.mulf %72, %75 : vector<8x128xf32>
    %77 = arith.addf %76, %70 : vector<8x128xf32>
    %78 = arith.truncf %77 : vector<8x128xf32> to vector<8x128xbf16>
    %c0_39 = arith.constant 0 : index
    %c0_40 = arith.constant 0 : index
    %79 = vector.load %arg12[%c0_39, %c0_40] : memref<128x128xbf16, #tpu.memory_space<vmem>>, vector<128x128xbf16>
    %cst_41 = arith.constant dense<0.000000e+00> : vector<8x128xf32>
    %80 = tpu.matmul %78, %79, %cst_41 {dimension_numbers = #tpu.dot_dimension_numbers<[1], [0], [0], [1], [0, 0, 1, 1], [], []>} : vector<8x128xbf16>, vector<128x128xbf16>, vector<8x128xf32> -> vector<8x128xf32>
    %cst_42 = arith.constant dense<0.000000e+00> : vector<128xf32>
    %81 = vector.multi_reduction <add>, %80, %cst_42 [0] : vector<8x128xf32> to vector<128xf32>
    %82 = vector.shape_cast %81 : vector<128xf32> to vector<1x128xf32>
    %cst_43 = arith.constant 1.250000e-01 : f32
    %83 = vector.broadcast %cst_43 : f32 to vector<1x128xf32>
    %84 = arith.mulf %82, %83 : vector<1x128xf32>
    %85 = arith.mulf %80, %80 : vector<8x128xf32>
    %cst_44 = arith.constant dense<0.000000e+00> : vector<128xf32>
    %86 = vector.multi_reduction <add>, %85, %cst_44 [0] : vector<8x128xf32> to vector<128xf32>
    %87 = vector.shape_cast %86 : vector<128xf32> to vector<1x128xf32>
    %cst_45 = arith.constant 1.250000e-01 : f32
    %88 = vector.broadcast %cst_45 : f32 to vector<1x128xf32>
    %89 = arith.mulf %87, %88 : vector<1x128xf32>
    %90 = arith.mulf %84, %84 : vector<1x128xf32>
    %91 = arith.subf %89, %90 : vector<1x128xf32>
    %92 = vector.broadcast %84 : vector<1x128xf32> to vector<8x128xf32>
    %93 = arith.subf %80, %92 : vector<8x128xf32>
    %cst_46 = arith.constant 9.99999974E-6 : f32
    %94 = vector.broadcast %cst_46 : f32 to vector<1x128xf32>
    %95 = arith.addf %91, %94 : vector<1x128xf32>
    %96 = math.rsqrt %95 : vector<1x128xf32>
    %97 = vector.broadcast %96 : vector<1x128xf32> to vector<8x128xf32>
    %98 = arith.mulf %93, %97 : vector<8x128xf32>
    %c0_47 = arith.constant 0 : index
    %c0_48 = arith.constant 0 : index
    %99 = vector.load %arg13[%c0_47, %c0_48] : memref<1x128xf32, #tpu.memory_space<vmem>>, vector<1x128xf32>
    %100 = vector.broadcast %99 : vector<1x128xf32> to vector<8x128xf32>
    %101 = arith.mulf %98, %100 : vector<8x128xf32>
    %c0_49 = arith.constant 0 : index
    %c0_50 = arith.constant 0 : index
    %102 = vector.load %arg14[%c0_49, %c0_50] : memref<1x128xf32, #tpu.memory_space<vmem>>, vector<1x128xf32>
    %103 = vector.broadcast %102 : vector<1x128xf32> to vector<8x128xf32>
    %104 = arith.addf %101, %103 : vector<8x128xf32>
    %cst_51 = arith.constant 0.000000e+00 : f32
    %105 = vector.broadcast %cst_51 : f32 to vector<8x128xf32>
    %106 = arith.maximumf %104, %105 : vector<8x128xf32>
    %107 = arith.truncf %106 : vector<8x128xf32> to vector<8x128xbf16>
    %c0_52 = arith.constant 0 : index
    %c0_53 = arith.constant 0 : index
    %108 = vector.load %arg15[%c0_52, %c0_53] : memref<128x128xbf16, #tpu.memory_space<vmem>>, vector<128x128xbf16>
    %cst_54 = arith.constant dense<0.000000e+00> : vector<8x128xf32>
    %109 = tpu.matmul %107, %108, %cst_54 {dimension_numbers = #tpu.dot_dimension_numbers<[1], [0], [0], [1], [0, 0, 1, 1], [], []>} : vector<8x128xbf16>, vector<128x128xbf16>, vector<8x128xf32> -> vector<8x128xf32>
    %cst_55 = arith.constant dense<0.000000e+00> : vector<128xf32>
    %110 = vector.multi_reduction <add>, %109, %cst_55 [0] : vector<8x128xf32> to vector<128xf32>
    %111 = vector.shape_cast %110 : vector<128xf32> to vector<1x128xf32>
    %cst_56 = arith.constant 1.250000e-01 : f32
    %112 = vector.broadcast %cst_56 : f32 to vector<1x128xf32>
    %113 = arith.mulf %111, %112 : vector<1x128xf32>
    %114 = arith.mulf %109, %109 : vector<8x128xf32>
    %cst_57 = arith.constant dense<0.000000e+00> : vector<128xf32>
    %115 = vector.multi_reduction <add>, %114, %cst_57 [0] : vector<8x128xf32> to vector<128xf32>
    %116 = vector.shape_cast %115 : vector<128xf32> to vector<1x128xf32>
    %cst_58 = arith.constant 1.250000e-01 : f32
    %117 = vector.broadcast %cst_58 : f32 to vector<1x128xf32>
    %118 = arith.mulf %116, %117 : vector<1x128xf32>
    %119 = arith.mulf %113, %113 : vector<1x128xf32>
    %120 = arith.subf %118, %119 : vector<1x128xf32>
    %121 = vector.broadcast %113 : vector<1x128xf32> to vector<8x128xf32>
    %122 = arith.subf %109, %121 : vector<8x128xf32>
    %cst_59 = arith.constant 9.99999974E-6 : f32
    %123 = vector.broadcast %cst_59 : f32 to vector<1x128xf32>
    %124 = arith.addf %120, %123 : vector<1x128xf32>
    %125 = math.rsqrt %124 : vector<1x128xf32>
    %126 = vector.broadcast %125 : vector<1x128xf32> to vector<8x128xf32>
    %127 = arith.mulf %122, %126 : vector<8x128xf32>
    %c0_60 = arith.constant 0 : index
    %c0_61 = arith.constant 0 : index
    %128 = vector.load %arg16[%c0_60, %c0_61] : memref<1x128xf32, #tpu.memory_space<vmem>>, vector<1x128xf32>
    %129 = vector.broadcast %128 : vector<1x128xf32> to vector<8x128xf32>
    %130 = arith.mulf %127, %129 : vector<8x128xf32>
    %c0_62 = arith.constant 0 : index
    %c0_63 = arith.constant 0 : index
    %131 = vector.load %arg17[%c0_62, %c0_63] : memref<1x128xf32, #tpu.memory_space<vmem>>, vector<1x128xf32>
    %132 = vector.broadcast %131 : vector<1x128xf32> to vector<8x128xf32>
    %133 = arith.addf %130, %132 : vector<8x128xf32>
    %cst_64 = arith.constant 0.000000e+00 : f32
    %134 = vector.broadcast %cst_64 : f32 to vector<8x128xf32>
    %135 = arith.maximumf %133, %134 : vector<8x128xf32>
    %136 = arith.truncf %135 : vector<8x128xf32> to vector<8x128xbf16>
    %c0_65 = arith.constant 0 : index
    %c0_66 = arith.constant 0 : index
    %137 = vector.load %arg18[%c0_65, %c0_66] : memref<128x128xbf16, #tpu.memory_space<vmem>>, vector<128x128xbf16>
    %cst_67 = arith.constant dense<0.000000e+00> : vector<8x128xf32>
    %138 = tpu.matmul %136, %137, %cst_67 {dimension_numbers = #tpu.dot_dimension_numbers<[1], [0], [0], [1], [0, 0, 1, 1], [], []>} : vector<8x128xbf16>, vector<128x128xbf16>, vector<8x128xf32> -> vector<8x128xf32>
    %c0_68 = arith.constant 0 : index
    %c0_69 = arith.constant 0 : index
    %139 = vector.load %arg19[%c0_68, %c0_69] : memref<1x128xf32, #tpu.memory_space<vmem>>, vector<1x128xf32>
    %140 = vector.broadcast %139 : vector<1x128xf32> to vector<8x128xf32>
    %141 = arith.addf %138, %140 : vector<8x128xf32>
    %c0_70 = arith.constant 0 : index
    %c0_71 = arith.constant 0 : index
    %142 = vector.load %arg20[%c0_70, %c0_71] : memref<8x128xf32, #tpu.memory_space<vmem>>, vector<8x128xf32>
    tpu.vector_store %arg20[%c0_70, %c0_71], %141 {strides = array<i32>} : memref<8x128xf32, #tpu.memory_space<vmem>>, vector<8x128xf32>,
    %c0_72 = arith.constant 0 : index
    %c0_73 = arith.constant 0 : index
    %143 = vector.load %arg21[%c0_72, %c0_73] : memref<8x128xf32, #tpu.memory_space<vmem>>, vector<8x128xf32>
    tpu.vector_store %arg21[%c0_72, %c0_73], %77 {strides = array<i32>} : memref<8x128xf32, #tpu.memory_space<vmem>>, vector<8x128xf32>,
    %c0_74 = arith.constant 0 : index
    %c0_75 = arith.constant 0 : index
    %144 = vector.load %arg22[%c0_74, %c0_75] : memref<8x128xf32, #tpu.memory_space<vmem>>, vector<8x128xf32>
    tpu.vector_store %arg22[%c0_74, %c0_75], %70 {strides = array<i32>} : memref<8x128xf32, #tpu.memory_space<vmem>>, vector<8x128xf32>,
    %c0_76 = arith.constant 0 : index
    %c0_77 = arith.constant 0 : index
    %145 = vector.load %arg23[%c0_76, %c0_77] : memref<8x128xf32, #tpu.memory_space<vmem>>, vector<8x128xf32>
    tpu.vector_store %arg23[%c0_76, %c0_77], %71 {strides = array<i32>} : memref<8x128xf32, #tpu.memory_space<vmem>>, vector<8x128xf32>,
    return
  }
}

</mosaic_0001>

<bundles_post_ra>
// kernel: forward.1
= control target key start
LH: loop header
LB: loop body
LE: loop exit
PB: predicated region body
PF: predicated region fallthrough
CT: control target
= control target key end

     0   :  { %s2041_s0 = inlined_call_operand.vmem [shape: f32[8,128], index: 0, kind: input, shape index: {}]   ;;  %s2042_s1 = inlined_call_operand.vmem [shape: f32[8,128], index: 1, kind: input, shape index: {}]   ;;  %s2043_s2 = inlined_call_operand.vmem [shape: f32[8,128], index: 2, kind: input, shape index: {}]   ;;  %s2044_s3 = inlined_call_operand.hbm [shape: bf16[128,128], index: 3, kind: input, shape index: {}]   ;;  %s2045_s4 = inlined_call_operand.hbm [shape: bf16[128,128], index: 4, kind: input, shape index: {}]   ;;  %s2046_s5 = inlined_call_operand.vmem [shape: f32[1,128], index: 5, kind: input, shape index: {}, may-alias: {5,16}]   ;;  %s2047_s6 = inlined_call_operand.vmem [shape: f32[1,128], index: 6, kind: input, shape index: {}, may-alias: {6,9,14,17}]   ;;  %s2048_s7 = inlined_call_operand.vmem [shape: bf16[128,128], index: 7, kind: input, shape index: {}]   ;;  %s2049_s8 = inlined_call_operand.vmem [shape: f32[1,128], index: 8, kind: input, shape index: {}, may-alias: {8,13}]   ;;  %s2050_s9 = inlined_call_operand.vmem [shape: f32[1,128], index: 9, kind: input, shape index: {}, may-alias: {6,9,14,17}]   ;;  %s2051_s10 = inlined_call_operand.vmem [shape: bf16[128,256], index: 10, kind: input, shape index: {}]   ;;  %s2052_s11 = inlined_call_operand.vmem [shape: f32[1,256], index: 11, kind: input, shape index: {}]   ;;  %s2053_s12 = inlined_call_operand.vmem [shape: bf16[128,128], index: 12, kind: input, shape index: {}]   ;;  %s2054_s13 = inlined_call_operand.vmem [shape: f32[1,128], index: 13, kind: input, shape index: {}, may-alias: {8,13}]   ;;  %s2055_s14 = inlined_call_operand.vmem [shape: f32[1,128], index: 14, kind: input, shape index: {}, may-alias: {6,9,14,17}]   ;;  %s2056_s15 = inlined_call_operand.vmem [shape: bf16[128,128], index: 15, kind: input, shape index: {}]   ;;  %s2057_s16 = inlined_call_operand.vmem [shape: f32[1,128], index: 16, kind: input, shape index: {}, may-alias: {5,16}]   ;;  %s2058_s17 = inlined_call_operand.vmem [shape: f32[1,128], index: 17, kind: input, shape index: {}, may-alias: {6,9,14,17}]   ;;  %s2059_s18 = inlined_call_operand.vmem [shape: bf16[128,128], index: 18, kind: input, shape index: {}]   ;;  %s2060_s19 = inlined_call_operand.vmem [shape: f32[1,128], index: 19, kind: input, shape index: {}]   ;;  %s2061_s20 = inlined_call_operand.hbm [shape: f32[8,128], index: 20, kind: output, shape index: {0}]   ;;  %s2062_s21 = inlined_call_operand.hbm [shape: f32[8,128], index: 21, kind: output, shape index: {1}]   ;;  %s2063_s22 = inlined_call_operand.hbm [shape: f32[8,128], index: 22, kind: output, shape index: {2}]   ;;  %s2064_s23 = inlined_call_operand.hbm [shape: f32[8,128], index: 23, kind: output, shape index: {3}]  }
   0x1   :  { %2069 = sst [smem:[#allocation18_spill]] %s2041_s0 }
   0x2   :  { %2070 = sst [smem:[#allocation19_spill]] %s2042_s1 }
   0x3   :  { %2071 = sst [smem:[#allocation20_spill]] %s2043_s2 }
   0x4   :  { %2072 = sst [smem:[#allocation21_spill]] %s2044_s3 }
   0x5   :  { %2073 = sst [smem:[#allocation22_spill]] %s2045_s4 }
   0x6   :  { %2074 = sst [smem:[#allocation23_spill]] %s2046_s5 }
   0x7   :  { %2075 = sst [smem:[#allocation24_spill]] %s2047_s6 }
   0x8   :  { %2076 = sst [smem:[#allocation25_spill]] %s2048_s7 }
   0x9   :  { %2077 = sst [smem:[#allocation26_spill]] %s2060_s19 }
   0xa   :  { %2078 = sst [smem:[#allocation27_spill]] %s2061_s20 }
   0xb   :  { %29 = vsyncpa [#allocation3], 0 }
   0xc   :  { %30 = vsyncpa [#allocation6], 0 }
   0xd   :  { %31 = vsyncpa [#allocation4], 0 }
   0xe   :  { %32 = vsyncpa [#allocation9], 0 }
   0xf   :  { %33 = vsyncpa [#allocation12], 0  ;;  %s1595_s4 = smov [#allocation2]   ;;  %s2079_s5 = sld [smem:[#allocation21_spill]] }
  0x10   :  { %s45_s30 = sshll.u32 %s1595_s4, 4  ;;  %s46_s30 = int_to_ptr.vmem [resolvable:$true] %s45_s30 }
  0x15   :  { %s1453_s1 = scalar_lea.hbm %s2079_s5, 1024 }
  0x16   :  { %p1454_p0 = scmp.ne.s32.totalorder %s2079_s5, %s1453_s1  ;;  %p1457_p1 = scmp.lt.u32.totalorder %s1453_s1, %s2079_s5 }
  0x18   :  { %p1459_p2 = pnand %p1457_p1, %p1454_p0 }
  0x1a   :  { %1462 = shalt.err (!%p1459_p2)
}
  0x1b   :  { %s1463_s7 = scalar_lea.vmem %s46_s30, 1024  ;;  %p1468_p4 = scmp.lt.s32.totalorder %s46_s30, %s46_s30 }
  0x1c   :  { %p1464_p3 = scmp.ne.s32.totalorder %s46_s30, %s1463_s7  ;;  %p1469_p5 = scmp.lt.s32.totalorder %s1463_s7, %s1463_s7 }
  0x1e   :  { %p1470_p6 = por %p1469_p5, %p1468_p4 }
  0x20   :  { %p1471_p7 = pnand %p1470_p6, %p1464_p3 }
  0x22   :  { %1474 = shalt.err (!%p1471_p7)
}
  0x23   :  { %s1596_s28 = smov 64   ;;  %s1597_s29 = smov 4  }
  0x24   :  { %51 = dma.hbm_to_vmem [thread:$0]  %s2079_s5, 1024, %s46_s30, [#allocation3], %s1596_s28, %s1596_s28, %s1597_s29  }
  0x25   :  { %s1598_s4 = smov [#allocation5]   ;;  %s2080_s26 = sld [smem:[#allocation22_spill]] }
  0x26   :  { %s57_s24 = sshll.u32 %s1598_s4, 4  ;;  %s58_s24 = int_to_ptr.vmem [resolvable:$true] %s57_s24 }
  0x2b   :  { %s1475_s2 = scalar_lea.hbm %s2080_s26, 1024 }
  0x2c   :  { %p1476_p8 = scmp.ne.s32.totalorder %s2080_s26, %s1475_s2  ;;  %p1479_p9 = scmp.lt.u32.totalorder %s1475_s2, %s2080_s26 }
  0x2e   :  { %p1481_p10 = pnand %p1479_p9, %p1476_p8 }
  0x30   :  { %1484 = shalt.err (!%p1481_p10)
}
  0x31   :  { %s1485_s19 = scalar_lea.vmem %s58_s24, 1024  ;;  %p1490_p12 = scmp.lt.s32.totalorder %s58_s24, %s58_s24 }
  0x32   :  { %p1486_p11 = scmp.ne.s32.totalorder %s58_s24, %s1485_s19  ;;  %p1491_p13 = scmp.lt.s32.totalorder %s1485_s19, %s1485_s19 }
  0x34   :  { %p1492_p0 = por %p1491_p13, %p1490_p12 }
  0x36   :  { %p1493_p1 = pnand %p1492_p0, %p1486_p11 }
  0x38   :  { %1496 = shalt.err (!%p1493_p1)
}
  0x39   :  { %63 = dma.hbm_to_vmem [thread:$0]  %s2080_s26, 1024, %s58_s24, [#allocation6], %s1596_s28, %s1596_s28, %s1597_s29  }
  0x3a   :  { %1585 = dma.done.wait [#allocation3], 1024  }
  0x3b   :  { %1586 = vsyncadd [#allocation3], 4294966272 }
  0x3c   :  { %1587 = dma.done.wait [#allocation6], 1024  }
  0x3d   :  { %1588 = vsyncadd [#allocation6], 4294966272  ;;  %v1599_v0 = vmov 0.0   ;;  %vm1600_vm0 = vmmov 0   ;;  %v1371_v1 = vld [vmem:[#allocation5] sm:$0xff]   ;;  %v1372_v2 = vld [vmem:[#allocation5 + $0x8] sm:$0xff]  }
  0x3e   :  { %1236 = vmatprep.subr.bf16.mxu0 %v1599_v0  ;;  %1252 = vmatprep.mubr.msk.bf16.mxu0 %vm1600_vm0, %v1599_v0  ;;  %v1373_v3 = vld [vmem:[#allocation5 + $0x10] sm:$0xff]   ;;  %v1374_v4 = vld [vmem:[#allocation5 + $0x18] sm:$0xff]   ;;  %v1375_v5 = vld [vmem:[#allocation5 + $0x20] sm:$0xff]   ;;  %s2081_s28 = sld [smem:[#allocation19_spill]]  ;;  %s2082_s0 = sld [smem:[#allocation18_spill]] }
  0x3f   :  { %1276 = vmatprep.subr.bf16.mxu1 %v1599_v0  ;;  %1292 = vmatprep.mubr.msk.bf16.mxu1 %vm1600_vm0, %v1599_v0  ;;  %v1376_v6 = vld [vmem:[#allocation5 + $0x28] sm:$0xff]   ;;  %v1377_v7 = vld [vmem:[#allocation5 + $0x30] sm:$0xff]   ;;  %v1378_v8 = vld [vmem:[#allocation5 + $0x38] sm:$0xff]   ;;  %s2083_s25 = sld [smem:[#allocation25_spill]]  ;;  %s2085_s2 = sld [smem:[#allocation24_spill]] }
  0x40   :  { %1237 = vmatpush3.bf16.msra.mxu0 %v1371_v1  ;;  %v1379_v10 = vld [vmem:[#allocation2] sm:$0xff]   ;;  %v1380_v12 = vld [vmem:[#allocation2 + $0x8] sm:$0xff]   ;;  %v1381_v13 = vld [vmem:[#allocation2 + $0x10] sm:$0xff]   ;;  %s2086_s27 = sld [smem:[#allocation20_spill]]  ;;  %s1602_s24 = smov [#allocation8]  }
  0x41   :  { %1238 = vmatprep.subr.bf16.mxu0 %v1599_v0  ;;  %v1382_v14 = vld [vmem:[#allocation2 + $0x18] sm:$0xff]   ;;  %v1383_v15 = vld [vmem:[#allocation2 + $0x20] sm:$0xff]   ;;  %v1384_v16 = vld [vmem:[#allocation2 + $0x28] sm:$0xff]  }
  0x42   :  { %v1385_v17 = vld [vmem:[#allocation2 + $0x30] sm:$0xff]   ;;  %v1386_v18 = vld [vmem:[#allocation2 + $0x38] sm:$0xff]   ;;  %v1397_v60 = vld [vmem:[%s2051_s10 + $0x4] ss:$8 sps:$4 sm:$0xff]  }
  0x43   :  { %v1395_v61 = vld [vmem:[%s2051_s10] ss:$8 sps:$4 sm:$0xff]   ;;  %v1400_v62 = vld [vmem:[%s2051_s10 + $0x14] ss:$8 sps:$4 sm:$0xff]   ;;  %v1398_v63 = vld [vmem:[%s2051_s10 + $0x10] ss:$8 sps:$4 sm:$0xff]  }
  0x44   :  { %1239 = vmatpush3.bf16.msra.mxu0 %v1372_v2  ;;  %v119_v9 = vld [vmem:[%s2081_s28] sm:$0xff] }
  0x45   :  { %1240 = vmatprep.subr.bf16.mxu0 %v1599_v0  ;;  %v120_v11 = vpack.c.bf16 %v119_v9, %v119_v9  ;;  %v101_v19 = vld [vmem:[%s2082_s0] sm:$0xff]  ;;  %v1388_v22 = vld [vmem:[%s2083_s25 + $0x8] sm:$0xff]   ;;  %v1389_v23 = vld [vmem:[%s2083_s25 + $0x10] sm:$0xff]  }
  0x46   :  { %v102_v20 = vpack.c.bf16 %v101_v19, %v101_v19  ;;  %v1387_v21 = vld [vmem:[%s2083_s25] sm:$0xff]   ;;  %v1390_v24 = vld [vmem:[%s2083_s25 + $0x18] sm:$0xff]   ;;  %v1392_v26 = vld [vmem:[%s2083_s25 + $0x28] sm:$0xff]  }
  0x47   :  { %1277 = vmatpush3.bf16.msra.mxu1 %v1387_v21  ;;  %v1391_v25 = vld [vmem:[%s2083_s25 + $0x20] sm:$0xff]   ;;  %v1393_v27 = vld [vmem:[%s2083_s25 + $0x30] sm:$0xff]   ;;  %v1394_v28 = vld [vmem:[%s2083_s25 + $0x38] sm:$0xff]   ;;  %s2084_s25 = sld [smem:[#allocation23_spill]] }
  0x48   :  { %1241 = vmatpush3.bf16.msra.mxu0 %v1373_v3  ;;  %1278 = vmatprep.subr.bf16.mxu1 %v1599_v0  ;;  %v1126_v55 = vld [vmem:[%s2085_s2] ss:$0 sm:$0xff]  ;;  %v1403_v1 = vld [vmem:[%s2051_s10 + $0x24] ss:$8 sps:$4 sm:$0xff]   ;;  %v1406_v3 = vld [vmem:[%s2051_s10 + $0x34] ss:$8 sps:$4 sm:$0xff]  }
  0x49   :  { %1242 = vmatprep.subr.bf16.mxu0 %v1599_v0  ;;  %v1401_v2 = vld [vmem:[%s2051_s10 + $0x20] ss:$8 sps:$4 sm:$0xff]   ;;  %v1415_v9 = vld [vmem:[%s2051_s10 + $0x64] ss:$8 sps:$4 sm:$0xff]  }
  0x4b   :  { %1279 = vmatpush3.bf16.msra.mxu1 %v1388_v22 }
  0x4c   :  { %1243 = vmatpush3.bf16.msra.mxu0 %v1374_v4  ;;  %1280 = vmatprep.subr.bf16.mxu1 %v1599_v0  ;;  %v1404_v4 = vld [vmem:[%s2051_s10 + $0x30] ss:$8 sps:$4 sm:$0xff]  }
  0x4d   :  { %1244 = vmatprep.subr.bf16.mxu0 %v1599_v0  ;;  %v1125_v53 = vld [vmem:[%s2084_s25] ss:$0 sm:$0xff]  ;;  %s1068_s25 = sshll.u32 %s1602_s24, 4  ;;  %s1069_s25 = int_to_ptr.vmem [resolvable:$true] %s1068_s25 }
  0x4e   :  { %p1502_p3 = scmp.lt.s32.totalorder %s1069_s25, %s1069_s25 }
  0x4f   :  { %1281 = vmatpush3.bf16.msra.mxu1 %v1389_v23 }
  0x50   :  { %1245 = vmatpush3.bf16.msra.mxu0 %v1375_v5  ;;  %1282 = vmatprep.subr.bf16.mxu1 %v1599_v0  ;;  %v1409_v5 = vld [vmem:[%s2051_s10 + $0x44] ss:$8 sps:$4 sm:$0xff]  }
  0x51   :  { %1246 = vmatprep.subr.bf16.mxu0 %v1599_v0 }
  0x53   :  { %1283 = vmatpush3.bf16.msra.mxu1 %v1390_v24 }
  0x54   :  { %1247 = vmatpush3.bf16.msra.mxu0 %v1376_v6  ;;  %1284 = vmatprep.subr.bf16.mxu1 %v1599_v0  ;;  %v1407_v6 = vld [vmem:[%s2051_s10 + $0x40] ss:$8 sps:$4 sm:$0xff]  }
  0x55   :  { %1248 = vmatprep.subr.bf16.mxu0 %v1599_v0 }
  0x57   :  { %1285 = vmatpush3.bf16.msra.mxu1 %v1391_v25 }
  0x58   :  { %1249 = vmatpush3.bf16.msra.mxu0 %v1377_v7  ;;  %1286 = vmatprep.subr.bf16.mxu1 %v1599_v0  ;;  %v1412_v7 = vld [vmem:[%s2051_s10 + $0x54] ss:$8 sps:$4 sm:$0xff]  }
  0x59   :  { %1250 = vmatprep.subr.bf16.mxu0 %v1599_v0 }
  0x5b   :  { %1287 = vmatpush3.bf16.msra.mxu1 %v1392_v26 }
  0x5c   :  { %1251 = vmatpush3.bf16.msra.mxu0 %v1378_v8  ;;  %1288 = vmatprep.subr.bf16.mxu1 %v1599_v0  ;;  %v1410_v8 = vld [vmem:[%s2051_s10 + $0x50] ss:$8 sps:$4 sm:$0xff]  }
  0x5d   :  { %1256 = vmatprep.subr.bf16.mxu0 %v1599_v0 }
  0x5f   :  { %1253 = vmatmul.mubr.bf16.vlgmr.msra.gmra.mrb[0].mxu0 %v120_v11  ;;  %1289 = vmatpush3.bf16.msra.mxu1 %v1393_v27  ;;  %v1418_v11 = vld [vmem:[%s2051_s10 + $0x74] ss:$8 sps:$4 sm:$0xff]  }
  0x60   :  { %1257 = vmatpush3.bf16.msra.mxu0 %v1379_v10  ;;  %1272 = vmatprep.mubr.msk.bf16.mxu0 %vm1600_vm0, %v1599_v0  ;;  %v1413_v10 = vld [vmem:[%s2051_s10 + $0x60] ss:$8 sps:$4 sm:$0xff]  }
  0x61   :  { %1258 = vmatprep.subr.bf16.mxu0 %v1599_v0  ;;  %1290 = vmatprep.subr.bf16.mxu1 %v1599_v0 }
  0x63   :  { %1291 = vmatpush3.bf16.msra.mxu1 %v1394_v28 }
  0x64   :  { %1259 = vmatpush3.bf16.msra.mxu0 %v1380_v12  ;;  %603 = vmatprep.subr.bf16.mxu1 %v1397_v60  ;;  %v1416_v12 = vld [vmem:[%s2051_s10 + $0x70] ss:$8 sps:$4 sm:$0xff]  }
  0x65   :  { %1260 = vmatprep.subr.bf16.mxu0 %v1599_v0 }
  0x68   :  { %1261 = vmatpush3.bf16.msra.mxu0 %v1381_v13  ;;  %v1601_v13 = vmov 0  }
  0x69   :  { %1262 = vmatprep.subr.bf16.mxu0 %v1599_v0 }
  0x6c   :  { %1263 = vmatpush3.bf16.msra.mxu0 %v1382_v14  ;;  %v1419_v14 = vld [vmem:[%s2053_s12] sm:$0xff]  }
  0x6d   :  { %1264 = vmatprep.subr.bf16.mxu0 %v1599_v0 }
  0x70   :  { %1265 = vmatpush3.bf16.msra.mxu0 %v1383_v15  ;;  %v1420_v15 = vld [vmem:[%s2053_s12 + $0x8] sm:$0xff]  }
  0x71   :  { %1266 = vmatprep.subr.bf16.mxu0 %v1599_v0 }
  0x74   :  { %1267 = vmatpush3.bf16.msra.mxu0 %v1384_v16 }
  0x75   :  { %1268 = vmatprep.subr.bf16.mxu0 %v1599_v0 }
  0x78   :  { %1269 = vmatpush3.bf16.msra.mxu0 %v1385_v17 }
  0x79   :  { %1270 = vmatprep.subr.bf16.mxu0 %v1599_v0 }
  0x7c   :  { %1271 = vmatpush3.bf16.msra.mxu0 %v1386_v18 }
  0x7d   :  { %1296 = vmatprep.subr.bf16.mxu0 %v1599_v0 }
  0x7f   :  { %1273 = vmatmul.mubr.bf16.vlgmr.msra.gmra.mrb[0].mxu0 %v102_v20 }
  0x80   :  { %1312 = vmatprep.mubr.msk.bf16.mxu0 %vm1600_vm0, %v1599_v0  ;;  %1297 = vmatpush3.bf16.msra.mxu0 %v1419_v14  ;;  %v1431_v14 = vld [vmem:[%s2056_s15 + $0x20] sm:$0xff]  }
  0x81   :  { %1298 = vmatprep.subr.bf16.mxu0 %v1599_v0 }
  0x84   :  { %1299 = vmatpush3.bf16.msra.mxu0 %v1420_v15  ;;  %v1432_v15 = vld [vmem:[%s2056_s15 + $0x28] sm:$0xff]  }
  0x85   :  { %1300 = vmatprep.subr.bf16.mxu0 %v1599_v0 }
 0x152   :  { %v307_v29 = vpop.f32.mrb[0].mxu0 }
 0x153   :  { %v313_v30 = vrot.slane %v307_v29, 4  ;;  %v320_v31 = vmul.f32 %v307_v29, %v307_v29  ;;  %v1274_v32 = vpop.f32.mrb[1].mxu0 }
 0x154   :  { %v310_v33 = vpop.f32.mrb[2].mxu0 }
 0x155   :  { %v314_v34 = vadd.f32 %v313_v30, %v307_v29  ;;  %v321_v35 = vrot.slane %v320_v31, 4  ;;  %v1275_v36 = vpop.f32.mrb[3].mxu0 }
 0x157   :  { %v315_v37 = vrot.slane %v314_v34, 2  ;;  %v322_v38 = vadd.f32 %v321_v35, %v320_v31 }
 0x159   :  { %v316_v39 = vadd.f32 %v315_v37, %v314_v34  ;;  %v323_v40 = vrot.slane %v322_v38, 2 }
 0x15b   :  { %v317_v41 = vrot.slane %v316_v39, 1  ;;  %v324_v42 = vadd.f32 %v323_v40, %v322_v38  ;;  %v1135_v40 = vld [vmem:[%s2049_s8] ss:$0 sm:$0xff] }
 0x15d   :  { %v318_v43 = vadd.f32 %v317_v41, %v316_v39  ;;  %v325_v44 = vrot.slane %v324_v42, 1 }
 0x15f   :  { %v319_v45 = vmul.f32 0.125, %v318_v43  ;;  %v326_v46 = vadd.f32 %v325_v44, %v324_v42  ;;  %v1136_v42 = vld [vmem:[%s2050_s9] ss:$0 sm:$0xff] }
 0x161   :  { %v327_v47 = vmul.f32 0.125, %v326_v46  ;;  %v328_v48 = vmul.f32 %v319_v45, %v319_v45  ;;  %v330_v51 = vsub.f32 %v307_v29, %v319_v45 }
 0x163   :  { %v329_v49 = vsub.f32 %v327_v47, %v328_v48  ;;  %v1421_v47 = vld [vmem:[%s2053_s12 + $0x10] sm:$0xff]   ;;  %v1422_v48 = vld [vmem:[%s2053_s12 + $0x18] sm:$0xff]  }
 0x164   :  { %1301 = vmatpush3.bf16.msra.mxu0 %v1421_v47 }
 0x165   :  { %v331_v50 = vadd.f32 1e-05, %v329_v49  ;;  %1302 = vmatprep.subr.bf16.mxu0 %v1599_v0  ;;  %v1423_v49 = vld [vmem:[%s2053_s12 + $0x20] sm:$0xff]  }
 0x167   :  { %1443 = vrsqrt.f32 %v331_v50  ;;  %v1424_v50 = vld [vmem:[%s2053_s12 + $0x28] sm:$0xff]  }
 0x168   :  { %1303 = vmatpush3.bf16.msra.mxu0 %v1422_v48 }
 0x169   :  { %1304 = vmatprep.subr.bf16.mxu0 %v1599_v0 }
 0x16c   :  { %1305 = vmatpush3.bf16.msra.mxu0 %v1423_v49  ;;  %v1435_v49 = vld [vmem:[%s2059_s18] sm:$0xff]  }
 0x16d   :  { %1306 = vmatprep.subr.bf16.mxu0 %v1599_v0 }
 0x170   :  { %1307 = vmatpush3.bf16.msra.mxu0 %v1424_v50  ;;  %v1436_v50 = vld [vmem:[%s2059_s18 + $0x8] sm:$0xff]  }
 0x171   :  { %v1444_v52 = vpop.eup %1443  ;;  %1308 = vmatprep.subr.bf16.mxu0 %v1599_v0 }
 0x172   :  { %v333_v54 = vmul.f32 %v1444_v52, %v330_v51  ;;  %v1425_v51 = vld [vmem:[%s2053_s12 + $0x30] sm:$0xff]   ;;  %v1426_v52 = vld [vmem:[%s2053_s12 + $0x38] sm:$0xff]  }
 0x174   :  { %v341_v56 = vmul.f32 %v1125_v53, %v333_v54  ;;  %1309 = vmatpush3.bf16.msra.mxu0 %v1425_v51  ;;  %v513_v53 = vlaneseq  ;;  %v1437_v51 = vld [vmem:[%s2059_s18 + $0x10] sm:$0xff]  }
 0x175   :  { %1310 = vmatprep.subr.bf16.mxu0 %v1599_v0 }
 0x176   :  { %v349_v57 = vadd.f32 %v1126_v55, %v341_v56  ;;  %v514_v54 = vshrl.u32 %v513_v53, 7  ;;  %v511_v56 = vld [vmem:[%s2052_s11] sm:$0x3] }
 0x177   :  { %v1439_v53 = vld [vmem:[%s2059_s18 + $0x20] sm:$0xff]  }
 0x178   :  { %v350_v58 = vmax.f32 %v349_v57, 0.0  ;;  %1311 = vmatpush3.bf16.msra.mxu0 %v1426_v52  ;;  %v515_v55 = vsub.s32 0, %v514_v54  ;;  %v519_v57 = vsub.s32 1, %v514_v54  ;;  %v1438_v52 = vld [vmem:[%s2059_s18 + $0x18] sm:$0xff]   ;;  %v1440_v54 = vld [vmem:[%s2059_s18 + $0x28] sm:$0xff]  }
 0x179   :  { %1336 = vmatprep.subr.bf16.mxu0 %v1599_v0 }
 0x17a   :  { %v351_v59 = vpack.c.bf16 %v350_v58, %v350_v58  ;;  %v516_v58 = vrot.slane %v511_v56, %v515_v55  ;;  %v1441_v55 = vld [vmem:[%s2059_s18 + $0x30] sm:$0xff]  }
 0x17c   :  { %1293 = vmatmul.mubr.bf16.vlgmr.msra.gmra.mrb[0].mxu1 %v351_v59  ;;  %v520_v59 = vrot.slane %v511_v56, %v519_v57  ;;  %v1442_v56 = vld [vmem:[%s2059_s18 + $0x38] sm:$0xff]  }
 0x17d   :  { %604 = vmatpush1.bf16.msra.mxu1 %v1395_v61  ;;  %635 = vmatprep.mubr.bf16.mxu1 %v1601_v13  ;;  %v1430_v13 = vld [vmem:[%s2056_s15 + $0x18] sm:$0xff]  }
 0x17e   :  { %605 = vmatprep.subr.bf16.mxu1 %v1400_v62 }
 0x181   :  { %606 = vmatpush1.bf16.msra.mxu1 %v1398_v63 }
 0x182   :  { %607 = vmatprep.subr.bf16.mxu1 %v1403_v1 }
 0x185   :  { %608 = vmatpush1.bf16.msra.mxu1 %v1401_v2 }
 0x186   :  { %609 = vmatprep.subr.bf16.mxu1 %v1406_v3 }
 0x189   :  { %610 = vmatpush1.bf16.msra.mxu1 %v1404_v4 }
 0x18a   :  { %611 = vmatprep.subr.bf16.mxu1 %v1409_v5  ;;  %v644_v5 = vld [vmem:[%s2086_s27] sm:$0xff] }
 0x18d   :  { %612 = vmatpush1.bf16.msra.mxu1 %v1407_v6 }
 0x18e   :  { %613 = vmatprep.subr.bf16.mxu1 %v1412_v7 }
 0x191   :  { %614 = vmatpush1.bf16.msra.mxu1 %v1410_v8 }
 0x192   :  { %615 = vmatprep.subr.bf16.mxu1 %v1415_v9 }
 0x195   :  { %616 = vmatpush1.bf16.msra.mxu1 %v1413_v10  ;;  %v1427_v10 = vld [vmem:[%s2056_s15] sm:$0xff]  }
 0x196   :  { %617 = vmatprep.subr.bf16.mxu1 %v1418_v11  ;;  %v1428_v11 = vld [vmem:[%s2056_s15 + $0x8] sm:$0xff]  }
 0x199   :  { %618 = vmatpush1.bf16.msra.mxu1 %v1416_v12  ;;  %v1429_v12 = vld [vmem:[%s2056_s15 + $0x10] sm:$0xff]  }
 0x19a   :  { %1316 = vmatprep.subr.bf16.mxu1 %v1599_v0 }
 0x24f   :  { %v450_v16 = vpop.f32.mrb[0].mxu1 }
 0x250   :  { %v456_v17 = vrot.slane %v450_v16, 4  ;;  %v463_v18 = vmul.f32 %v450_v16, %v450_v16  ;;  %v1294_v19 = vpop.f32.mrb[1].mxu1 }
 0x251   :  { %v453_v20 = vpop.f32.mrb[2].mxu1 }
 0x252   :  { %v457_v21 = vadd.f32 %v456_v17, %v450_v16  ;;  %v464_v22 = vrot.slane %v463_v18, 4  ;;  %v1295_v23 = vpop.f32.mrb[3].mxu1  ;;  %v1434_v17 = vld [vmem:[%s2056_s15 + $0x38] sm:$0xff]  }
 0x254   :  { %v458_v24 = vrot.slane %v457_v21, 2  ;;  %v465_v25 = vadd.f32 %v464_v22, %v463_v18 }
 0x256   :  { %v459_v26 = vadd.f32 %v458_v24, %v457_v21  ;;  %v466_v27 = vrot.slane %v465_v25, 2 }
 0x258   :  { %v460_v28 = vrot.slane %v459_v26, 1  ;;  %v467_v29 = vadd.f32 %v466_v27, %v465_v25 }
 0x25a   :  { %v461_v30 = vadd.f32 %v460_v28, %v459_v26  ;;  %v468_v31 = vrot.slane %v467_v29, 1 }
 0x25c   :  { %v462_v32 = vmul.f32 0.125, %v461_v30  ;;  %v469_v33 = vadd.f32 %v468_v31, %v467_v29 }
 0x25e   :  { %v470_v34 = vmul.f32 0.125, %v469_v33  ;;  %v471_v35 = vmul.f32 %v462_v32, %v462_v32  ;;  %v473_v38 = vsub.f32 %v450_v16, %v462_v32  ;;  %v1433_v16 = vld [vmem:[%s2056_s15 + $0x30] sm:$0xff]   ;;  %s1497_s15 = scalar_lea.vmem %s1069_s25, 128 }
 0x25f   :  { %p1498_p2 = scmp.ne.s32.totalorder %s1069_s25, %s1497_s15  ;;  %p1503_p4 = scmp.lt.s32.totalorder %s1497_s15, %s1497_s15 }
 0x260   :  { %v472_v36 = vsub.f32 %v470_v34, %v471_v35 }
 0x261   :  { %p1504_p5 = por %p1503_p4, %p1502_p3 }
 0x262   :  { %v474_v37 = vadd.f32 1e-05, %v472_v36 }
 0x263   :  { %p1505_p6 = pnand %p1504_p5, %p1498_p2 }
 0x264   :  { %1445 = vrsqrt.f32 %v474_v37 }
 0x26e   :  { %v1446_v39 = vpop.eup %1445 }
 0x26f   :  { %v476_v41 = vmul.f32 %v1446_v39, %v473_v38 }
 0x271   :  { %v484_v43 = vmul.f32 %v1135_v40, %v476_v41 }
 0x273   :  { %v492_v44 = vadd.f32 %v1136_v42, %v484_v43  ;;  %v1161_v42 = vld [vmem:[%s2054_s13] ss:$0 sm:$0xff] }
 0x275   :  { %v493_v45 = vmax.f32 %v492_v44, 0.0  ;;  %v1162_v44 = vld [vmem:[%s2055_s14] ss:$0 sm:$0xff] }
 0x277   :  { %v494_v46 = vpack.c.bf16 %v493_v45, %v493_v45 }
 0x279   :  { %636 = vmatmul.mubr.bf16.vlgmr.msra.gmra.mrb[4].mxu1 %v494_v46 }
 0x27a   :  { %1332 = vmatprep.mubr.msk.bf16.mxu1 %vm1600_vm0, %v1599_v0  ;;  %1317 = vmatpush3.bf16.msra.mxu1 %v1427_v10 }
 0x27b   :  { %1318 = vmatprep.subr.bf16.mxu1 %v1599_v0 }
 0x27e   :  { %1319 = vmatpush3.bf16.msra.mxu1 %v1428_v11 }
 0x27f   :  { %1320 = vmatprep.subr.bf16.mxu1 %v1599_v0 }
 0x282   :  { %1321 = vmatpush3.bf16.msra.mxu1 %v1429_v12 }
 0x283   :  { %1322 = vmatprep.subr.bf16.mxu1 %v1599_v0 }
 0x286   :  { %1323 = vmatpush3.bf16.msra.mxu1 %v1430_v13 }
 0x287   :  { %1324 = vmatprep.subr.bf16.mxu1 %v1599_v0 }
 0x28a   :  { %1325 = vmatpush3.bf16.msra.mxu1 %v1431_v14 }
 0x28b   :  { %1326 = vmatprep.subr.bf16.mxu1 %v1599_v0 }
 0x28e   :  { %1327 = vmatpush3.bf16.msra.mxu1 %v1432_v15 }
 0x28f   :  { %1328 = vmatprep.subr.bf16.mxu1 %v1599_v0 }
 0x292   :  { %1329 = vmatpush3.bf16.msra.mxu1 %v1433_v16 }
 0x293   :  { %1330 = vmatprep.subr.bf16.mxu1 %v1599_v0 }
 0x296   :  { %1331 = vmatpush3.bf16.msra.mxu1 %v1434_v17  ;;  %v1171_v17 = vld [vmem:[%s2057_s16] ss:$0 sm:$0xff] }
 0x34c   :  { %v637_v60 = vpop.f32.mrb[4].mxu1 }
 0x34d   :  { %v638_v61 = vadd.f32 %v637_v60, %v516_v58  ;;  %v639_v62 = vpop.f32.mrb[5].mxu1 }
 0x34e   :  { %v640_v63 = vadd.f32 %v639_v62, %v520_v59  ;;  %v641_v1 = vpop.f32.mrb[6].mxu1 }
 0x34f   :  { %1050 = vst [vmem:[#allocation10] sm:$0xff] %v638_v61  ;;  %v642_v2 = vpop.f32.mrb[7].mxu1 }
 0x350   :  { %v645_v3 = vmul.f32 0.5, %v640_v63  ;;  %1051 = vst [vmem:[#allocation11] sm:$0xff] %v640_v63 }
 0x352   :  { %v646_v4 = vmul.f32 1.442695, %v645_v3 }
 0x354   :  { %1447 = vpow2.f32 %v646_v4 }
 0x35e   :  { %v1448_v6 = vpop.eup %1447 }
 0x35f   :  { %v648_v7 = vmul.f32 %v1448_v6, %v644_v5 }
 0x361   :  { %v649_v8 = vadd.f32 %v648_v7, %v638_v61 }
 0x363   :  { %v650_v9 = vpack.c.bf16 %v649_v8, %v649_v8  ;;  %1049 = vst [vmem:[#allocation8] sm:$0xff] %v649_v8 }
 0x365   :  { %1313 = vmatmul.mubr.bf16.vlgmr.msra.gmra.mrb[4].mxu0 %v650_v9 }
 0x366   :  { %1352 = vmatprep.mubr.msk.bf16.mxu0 %vm1600_vm0, %v1599_v0  ;;  %1337 = vmatpush3.bf16.msra.mxu0 %v1435_v49 }
 0x367   :  { %1338 = vmatprep.subr.bf16.mxu0 %v1599_v0 }
 0x36a   :  { %1339 = vmatpush3.bf16.msra.mxu0 %v1436_v50 }
 0x36b   :  { %1340 = vmatprep.subr.bf16.mxu0 %v1599_v0 }
 0x36e   :  { %1341 = vmatpush3.bf16.msra.mxu0 %v1437_v51 }
 0x36f   :  { %1342 = vmatprep.subr.bf16.mxu0 %v1599_v0 }
 0x372   :  { %1343 = vmatpush3.bf16.msra.mxu0 %v1438_v52 }
 0x373   :  { %1344 = vmatprep.subr.bf16.mxu0 %v1599_v0 }
 0x376   :  { %1345 = vmatpush3.bf16.msra.mxu0 %v1439_v53 }
 0x377   :  { %1346 = vmatprep.subr.bf16.mxu0 %v1599_v0 }
 0x37a   :  { %1347 = vmatpush3.bf16.msra.mxu0 %v1440_v54 }
 0x37b   :  { %1348 = vmatprep.subr.bf16.mxu0 %v1599_v0 }
 0x37e   :  { %1349 = vmatpush3.bf16.msra.mxu0 %v1441_v55 }
 0x37f   :  { %1350 = vmatprep.subr.bf16.mxu0 %v1599_v0 }
 0x382   :  { %1351 = vmatpush3.bf16.msra.mxu0 %v1442_v56 }
 0x438   :  { %v749_v18 = vpop.f32.mrb[4].mxu0 }
 0x439   :  { %v755_v19 = vrot.slane %v749_v18, 4  ;;  %v762_v20 = vmul.f32 %v749_v18, %v749_v18  ;;  %v1314_v21 = vpop.f32.mrb[5].mxu0 }
 0x43a   :  { %v752_v22 = vpop.f32.mrb[6].mxu0 }
 0x43b   :  { %v756_v23 = vadd.f32 %v755_v19, %v749_v18  ;;  %v763_v24 = vrot.slane %v762_v20, 4  ;;  %v1315_v25 = vpop.f32.mrb[7].mxu0  ;;  %v1172_v19 = vld [vmem:[%s2058_s17] ss:$0 sm:$0xff] }
 0x43d   :  { %v757_v26 = vrot.slane %v756_v23, 2  ;;  %v764_v27 = vadd.f32 %v763_v24, %v762_v20 }
 0x43f   :  { %v758_v28 = vadd.f32 %v757_v26, %v756_v23  ;;  %v765_v29 = vrot.slane %v764_v27, 2 }
 0x441   :  { %v759_v30 = vrot.slane %v758_v28, 1  ;;  %v766_v31 = vadd.f32 %v765_v29, %v764_v27 }
 0x443   :  { %v760_v32 = vadd.f32 %v759_v30, %v758_v28  ;;  %v767_v33 = vrot.slane %v766_v31, 1 }
 0x445   :  { %v761_v34 = vmul.f32 0.125, %v760_v32  ;;  %v768_v35 = vadd.f32 %v767_v33, %v766_v31 }
 0x447   :  { %v769_v36 = vmul.f32 0.125, %v768_v35  ;;  %v770_v37 = vmul.f32 %v761_v34, %v761_v34  ;;  %v772_v40 = vsub.f32 %v749_v18, %v761_v34 }
 0x449   :  { %v771_v38 = vsub.f32 %v769_v36, %v770_v37 }
 0x44b   :  { %v773_v39 = vadd.f32 1e-05, %v771_v38 }
 0x44d   :  { %1449 = vrsqrt.f32 %v773_v39 }
 0x457   :  { %v1450_v41 = vpop.eup %1449 }
 0x458   :  { %v775_v43 = vmul.f32 %v1450_v41, %v772_v40 }
 0x45a   :  { %v783_v45 = vmul.f32 %v1161_v42, %v775_v43 }
 0x45c   :  { %v791_v46 = vadd.f32 %v1162_v44, %v783_v45 }
 0x45e   :  { %v792_v47 = vmax.f32 %v791_v46, 0.0 }
 0x460   :  { %v793_v48 = vpack.c.bf16 %v792_v47, %v792_v47 }
 0x462   :  { %1333 = vmatmul.mubr.bf16.vlgmr.msra.gmra.mrb[8].mxu1 %v793_v48 }
 0x535   :  { %v892_v57 = vpop.f32.mrb[8].mxu1 }
 0x536   :  { %v898_v58 = vrot.slane %v892_v57, 4  ;;  %v905_v59 = vmul.f32 %v892_v57, %v892_v57  ;;  %v1334_v60 = vpop.f32.mrb[9].mxu1 }
 0x537   :  { %v895_v61 = vpop.f32.mrb[10].mxu1 }
 0x538   :  { %v899_v62 = vadd.f32 %v898_v58, %v892_v57  ;;  %v906_v63 = vrot.slane %v905_v59, 4  ;;  %v1335_v1 = vpop.f32.mrb[11].mxu1 }
 0x53a   :  { %v900_v2 = vrot.slane %v899_v62, 2  ;;  %v907_v3 = vadd.f32 %v906_v63, %v905_v59 }
 0x53c   :  { %v901_v4 = vadd.f32 %v900_v2, %v899_v62  ;;  %v908_v5 = vrot.slane %v907_v3, 2 }
 0x53e   :  { %v902_v6 = vrot.slane %v901_v4, 1  ;;  %v909_v7 = vadd.f32 %v908_v5, %v907_v3 }
 0x540   :  { %v903_v8 = vadd.f32 %v902_v6, %v901_v4  ;;  %v910_v9 = vrot.slane %v909_v7, 1 }
 0x542   :  { %v904_v10 = vmul.f32 0.125, %v903_v8  ;;  %v911_v11 = vadd.f32 %v910_v9, %v909_v7 }
 0x544   :  { %v912_v0 = vmul.f32 0.125, %v911_v11  ;;  %v913_v12 = vmul.f32 %v904_v10, %v904_v10  ;;  %v915_v15 = vsub.f32 %v892_v57, %v904_v10 }
 0x546   :  { %v914_v13 = vsub.f32 %v912_v0, %v913_v12 }
 0x548   :  { %v916_v14 = vadd.f32 1e-05, %v914_v13 }
 0x54a   :  { %1451 = vrsqrt.f32 %v916_v14 }
 0x554   :  { %v1452_v16 = vpop.eup %1451 }
 0x555   :  { %v918_v18 = vmul.f32 %v1452_v16, %v915_v15 }
 0x557   :  { %v926_v20 = vmul.f32 %v1171_v17, %v918_v18 }
 0x559   :  { %v934_v21 = vadd.f32 %v1172_v19, %v926_v20 }
 0x55b   :  { %v935_v22 = vmax.f32 %v934_v21, 0.0 }
 0x55d   :  { %v936_v23 = vpack.c.bf16 %v935_v22, %v935_v22 }
 0x55f   :  { %1353 = vmatmul.mubr.bf16.vlgmr.msra.gmra.mrb[8].mxu0 %v936_v23 }
 0x560   :  { %1508 = shalt.err (!%p1505_p6)
}
 0x561   :  { %s1509_s26 = scalar_lea.hbm %s2062_s21, 128 }
 0x562   :  { %p1510_p7 = scmp.ne.s32.totalorder %s2062_s21, %s1509_s26  ;;  %p1513_p8 = scmp.lt.u32.totalorder %s1509_s26, %s2062_s21 }
 0x564   :  { %p1515_p9 = pnand %p1513_p8, %p1510_p7 }
 0x566   :  { %1518 = shalt.err (!%p1515_p9)
}
 0x567   :  { %1071 = dma.vmem_to_hbm [thread:$0]  %s1069_s25, 128, %s2062_s21, [#allocation9]  }
 0x568   :  { %s1603_s13 = smov [#allocation10]   ;;  %s1604_s10 = smov [#allocation11]  }
 0x569   :  { %s1078_s14 = sshll.u32 %s1603_s13, 4  ;;  %s1088_s7 = sshll.u32 %s1604_s10, 4  ;;  %s1079_s14 = int_to_ptr.vmem [resolvable:$true] %s1078_s14  ;;  %s1089_s7 = int_to_ptr.vmem [resolvable:$true] %s1088_s7 }
 0x56a   :  { %s1519_s30 = scalar_lea.vmem %s1079_s14, 128  ;;  %p1524_p11 = scmp.lt.s32.totalorder %s1079_s14, %s1079_s14 }
 0x56b   :  { %p1520_p10 = scmp.ne.s32.totalorder %s1079_s14, %s1519_s30  ;;  %p1525_p12 = scmp.lt.s32.totalorder %s1519_s30, %s1519_s30 }
 0x56d   :  { %p1526_p13 = por %p1525_p12, %p1524_p11 }
 0x56f   :  { %p1527_p0 = pnand %p1526_p13, %p1520_p10 }
 0x571   :  { %1530 = shalt.err (!%p1527_p0)
}
 0x572   :  { %s1531_s20 = scalar_lea.hbm %s2063_s22, 128 }
 0x573   :  { %p1532_p1 = scmp.ne.s32.totalorder %s2063_s22, %s1531_s20  ;;  %p1535_p2 = scmp.lt.u32.totalorder %s1531_s20, %s2063_s22 }
 0x575   :  { %p1537_p3 = pnand %p1535_p2, %p1532_p1 }
 0x577   :  { %1540 = shalt.err (!%p1537_p3)
}
 0x578   :  { %1081 = dma.vmem_to_hbm [thread:$0]  %s1079_s14, 128, %s2063_s22, [#allocation9]  }
 0x579   :  { %s1541_s3 = scalar_lea.vmem %s1089_s7, 128  ;;  %p1546_p5 = scmp.lt.s32.totalorder %s1089_s7, %s1089_s7 }
 0x57a   :  { %p1542_p4 = scmp.ne.s32.totalorder %s1089_s7, %s1541_s3  ;;  %p1547_p6 = scmp.lt.s32.totalorder %s1541_s3, %s1541_s3 }
 0x57c   :  { %p1548_p7 = por %p1547_p6, %p1546_p5 }
 0x57e   :  { %p1549_p8 = pnand %p1548_p7, %p1542_p4 }
 0x580   :  { %1552 = shalt.err (!%p1549_p8)
}
 0x581   :  { %s1553_s24 = scalar_lea.hbm %s2064_s23, 128 }
 0x582   :  { %p1554_p9 = scmp.ne.s32.totalorder %s2064_s23, %s1553_s24  ;;  %p1557_p10 = scmp.lt.u32.totalorder %s1553_s24, %s2064_s23 }
 0x584   :  { %p1559_p11 = pnand %p1557_p10, %p1554_p9 }
 0x586   :  { %1562 = shalt.err (!%p1559_p11)
}
 0x587   :  { %1091 = dma.vmem_to_hbm [thread:$0]  %s1089_s7, 128, %s2064_s23, [#allocation12]  }
 0x588   :  { %s2087_s12 = sld [smem:[#allocation26_spill]]  ;;  %s1605_s6 = smov [#allocation7]  }
 0x589   :  { %s1058_s27 = sshll.u32 %s1605_s6, 4  ;;  %s1059_s27 = int_to_ptr.vmem [resolvable:$true] %s1058_s27 }
 0x58a   :  { %s1563_s11 = scalar_lea.vmem %s1059_s27, 128  ;;  %p1568_p13 = scmp.lt.s32.totalorder %s1059_s27, %s1059_s27 }
 0x58b   :  { %p1564_p12 = scmp.ne.s32.totalorder %s1059_s27, %s1563_s11  ;;  %p1569_p0 = scmp.lt.s32.totalorder %s1563_s11, %s1563_s11 }
 0x58d   :  { %p1570_p1 = por %p1569_p0, %p1568_p13 }
 0x58e   :  { %v1173_v24 = vld [vmem:[%s2087_s12] ss:$0 sm:$0xff] }
 0x58f   :  { %p1571_p2 = pnand %p1570_p1, %p1564_p12 }
 0x632   :  { %v1042_v25 = vpop.f32.mrb[8].mxu0 }
 0x633   :  { %v1043_v26 = vadd.f32 %v1173_v24, %v1042_v25  ;;  %v1354_v27 = vpop.f32.mrb[9].mxu0 }
 0x634   :  { %v1045_v28 = vpop.f32.mrb[10].mxu0 }
 0x635   :  { %1048 = vst [vmem:[#allocation7] sm:$0xff] %v1043_v26  ;;  %v1355_v29 = vpop.f32.mrb[11].mxu0 }
 0x636   :  { %1574 = shalt.err (!%p1571_p2)
}
 0x637   :  { %s2088_s14 = sld [smem:[#allocation27_spill]] }
 0x63d   :  { %s1575_s10 = scalar_lea.hbm %s2088_s14, 128 }
 0x63e   :  { %p1576_p3 = scmp.ne.s32.totalorder %s2088_s14, %s1575_s10  ;;  %p1579_p4 = scmp.lt.u32.totalorder %s1575_s10, %s2088_s14 }
 0x640   :  { %p1581_p5 = pnand %p1579_p4, %p1576_p3 }
 0x642   :  { %1584 = shalt.err (!%p1581_p5)
}
 0x643   :  { %1061 = dma.vmem_to_hbm [thread:$0]  %s1059_s27, 128, %s2088_s14, [#allocation4]  }
 0x644   :  { %1589 = dma.done.wait [#allocation4], 128  }
 0x645   :  { %1590 = vsyncadd [#allocation4], 4294967168 }
 0x646   :  { %1591 = dma.done.wait [#allocation9], 256  }
 0x647   :  { %1592 = vsyncadd [#allocation9], 4294967040 }
 0x648   :  { %1593 = dma.done.wait [#allocation12], 128  }
 0x649   :  { %1594 = vsyncadd [#allocation12], 4294967168 }
 0x64a   :  { %1104 = vsyncpa [#allocation3], 1 }
 0x64b   :  { %1105 = vsyncpa [#allocation6], 1 }
 0x64c   :  { %1106 = vsyncpa [#allocation4], 1 }
 0x64d   :  { %1107 = vsyncpa [#allocation9], 1 }
 0x64e   :  { %1108 = vsyncpa [#allocation12], 1 }

</bundles_post_ra>
